<compile_context>
chip_gen: v6e
topology: v6e:2x2x1
jax: 0.10.0
libtpu: 0.0.40
codegen_flags: <defaults>
</compile_context>

<pallas_src>
import functools

import jax
import jax.numpy as jnp
from jax.experimental import pallas as pl
from jax.experimental.pallas import tpu as pltpu

H1, H2, N_OUT, LANES = 32, 16, 3, 128


def _round_up(n, m):
    return ((n + m - 1) // m) * m


def _pack_layout(input_dim, output_dim):
    """8-aligned row offsets of each tensor inside the packed (ROWS, 128) buffer."""
    r_w1x = 0
    r_w1y = _round_up(r_w1x + input_dim, 8)
    r_b1 = _round_up(r_w1y + output_dim, 8)
    r_w2 = _round_up(r_b1 + 1, 8)
    r_b2 = _round_up(r_w2 + H1, 8)
    r_w3 = _round_up(r_b2 + 1, 8)
    r_b3 = _round_up(r_w3 + H2, 8)
    rows = _round_up(r_b3 + 1, 8)
    return {"w1x": r_w1x, "w1y": r_w1y, "b1": r_b1, "w2": r_w2,
            "b2": r_b2, "w3": r_w3, "b3": r_b3, "rows": rows}


def pack_params(params, input_dim, output_dim):
    """Pack w1,b1,w2,b2,w3,b3 into one lane-padded f32 buffer.

    W1 is split into its x-rows and y-rows (so the kernel never needs a
    concatenated input), and W3/b3 are zero-padded to 128 output lanes so the
    final store is lane-dense.
    """
    lay = _pack_layout(input_dim, output_dim)
    buf = jnp.zeros((lay["rows"], LANES), jnp.float32)
    w1 = params["w1"].astype(jnp.float32)
    buf = buf.at[lay["w1x"]:lay["w1x"] + input_dim, :H1].set(w1[:input_dim])
    buf = buf.at[lay["w1y"]:lay["w1y"] + output_dim, :H1].set(w1[input_dim:])
    buf = buf.at[lay["b1"], :H1].set(params["b1"].reshape(H1).astype(jnp.float32))
    buf = buf.at[lay["w2"]:lay["w2"] + H1, :H2].set(params["w2"].astype(jnp.float32))
    buf = buf.at[lay["b2"], :H2].set(params["b2"].reshape(H2).astype(jnp.float32))
    buf = buf.at[lay["w3"]:lay["w3"] + H2, :N_OUT].set(params["w3"].astype(jnp.float32))
    buf = buf.at[lay["b3"], :N_OUT].set(params["b3"].reshape(N_OUT).astype(jnp.float32))
    return buf


def _controller_kernel(x_ref, y_ref, w_ref, out_ref, *, input_dim, output_dim, lay):
    """Fused 3-layer MLP on one batch tile:
         h1 = relu(x@W1x + y@W1y + b1)
         h2 = relu(h1@W2 + b2)
         out = sigmoid(h2@W3p + b3p) * [1,1,5,1..] + [0,0,1,0..]
    All three matmuls accumulate in f32 on the MXU; activations + the
    gen_factor affine epilogue ride the VPU/EUP.  The output block is 128
    lanes wide (lane-dense store); only cols 0..2 are meaningful.
    """
    w = w_ref[...]                       # (ROWS, 128), resident across grid steps
    x = x_ref[...]
    y = y_ref[...]

    w1x = w[lay["w1x"]:lay["w1x"] + input_dim, :H1]
    w1y = w[lay["w1y"]:lay["w1y"] + output_dim, :H1]
    b1 = w[lay["b1"]:lay["b1"] + 1, :H1]
    w2 = w[lay["w2"]:lay["w2"] + H1, :H2]
    b2 = w[lay["b2"]:lay["b2"] + 1, :H2]
    w3 = w[lay["w3"]:lay["w3"] + H2, :]      # (16, 128), zero cols >= 3
    b3 = w[lay["b3"]:lay["b3"] + 1, :]       # (1, 128)

    h1 = (jnp.dot(x, w1x, preferred_element_type=jnp.float32)
          + jnp.dot(y, w1y, preferred_element_type=jnp.float32) + b1)
    h1 = jnp.maximum(h1, 0.0)
    h2 = jnp.dot(h1, w2, preferred_element_type=jnp.float32) + b2
    h2 = jnp.maximum(h2, 0.0)
    logits = jnp.dot(h2, w3, preferred_element_type=jnp.float32) + b3
    sig = jax.nn.sigmoid(logits)

    # Fused epilogue: gen_factor (column 2) gets *5 + 1; padded cols discarded later.
    col = jax.lax.broadcasted_iota(jnp.int32, sig.shape, 1)
    scale = jnp.where(col == 2, 5.0, 1.0)
    shift = jnp.where(col == 2, 1.0, 0.0)
    out_ref[...] = sig * scale + shift


def meta_augmentation_controller(x, y, packed_params, *, tile_b=512):
    """Forward pass of MetaAugmentationController.

    x: (B, input_dim) f32, y: (B, output_dim) f32,
    packed_params: (ROWS, 128) f32 from pack_params().
    Returns dict of (B,) arrays: 'noise_level', 'mix_ratio', 'gen_factor'.
    """
    B, input_dim = x.shape
    output_dim = y.shape[1]
    lay = _pack_layout(input_dim, output_dim)
    assert packed_params.shape == (lay["rows"], LANES)

    x = x.astype(jnp.float32)
    y = y.astype(jnp.float32)

    # Batch tiling: multiple of 8 sublanes, capped at 512 rows.  Per-step VMEM
    # (incl. 128-lane padding and double buffering) stays well under the
    # scoped limit on v5e/v6e/v7x.
    tile_b = min(tile_b, _round_up(max(B, 1), 8))
    b_pad = _round_up(B, tile_b)
    if b_pad != B:
        x = jnp.pad(x, ((0, b_pad - B), (0, 0)))
        y = jnp.pad(y, ((0, b_pad - B), (0, 0)))

    kernel = functools.partial(_controller_kernel, input_dim=input_dim,
                               output_dim=output_dim, lay=lay)

    out = pl.pallas_call(
        kernel,
        out_shape=jax.ShapeDtypeStruct((b_pad, LANES), jnp.float32),
        grid=(b_pad // tile_b,),
        in_specs=[
            pl.BlockSpec((tile_b, input_dim), lambda i: (i, 0)),
            pl.BlockSpec((tile_b, output_dim), lambda i: (i, 0)),
            pl.BlockSpec((lay["rows"], LANES), lambda i: (0, 0)),  # weights: DMA once
        ],
        out_specs=pl.BlockSpec((tile_b, LANES), lambda i: (i, 0)),  # lane-dense store
        compiler_params=pltpu.CompilerParams(
            dimension_semantics=("parallel",),          # megacore split on v7x
            vmem_limit_bytes=32 * 1024 * 1024,
        ),
    )(x, y, packed_params)

    # Slice the three real columns in the wrapper (keeps the in-kernel store
    # unmasked / lane-dense).  gen_factor's *5+1 was applied in-kernel.
    return {
        "noise_level": out[:B, 0],
        "mix_ratio": out[:B, 1],
        "gen_factor": out[:B, 2],
    }


def init_params(key, input_dim, output_dim):
    """Deterministic init mimicking PyTorch nn.Linear default (U(-1/sqrt(fan_in), +))."""
    dims = [(input_dim + output_dim, H1), (H1, H2), (H2, N_OUT)]
    names = [("w1", "b1"), ("w2", "b2"), ("w3", "b3")]
    params = {}
    for (fan_in, fan_out), (wn, bn) in zip(dims, names):
        key, kw, kb = jax.random.split(key, 3)
        bound = 1.0 / jnp.sqrt(float(fan_in))
        params[wn] = jax.random.uniform(kw, (fan_in, fan_out), jnp.float32,
                                        -bound, bound)
        params[bn] = jax.random.uniform(kb, (1, fan_out), jnp.float32,
                                        -bound, bound)
    return params


if __name__ == "__main__":
    input_dim, output_dim, batch = 4, 4, 2

    key = jax.random.PRNGKey(0)
    kp, kx, ky = jax.random.split(key, 3)
    params = init_params(kp, input_dim, output_dim)
    packed = pack_params(params, input_dim, output_dim)

    x = jax.random.normal(kx, (batch, input_dim), jnp.float32)
    y = jax.random.normal(ky, (batch, output_dim), jnp.float32)

    out = meta_augmentation_controller(x, y, packed)
    out = jax.tree_util.tree_map(jax.block_until_ready, out)

    # Pure-JAX reference (same math path as the PyTorch module, no Pallas).
    xy = jnp.concatenate([x, y], axis=1)
    h1 = jnp.maximum(xy @ params["w1"] + params["b1"], 0.0)
    h2 = jnp.maximum(h1 @ params["w2"] + params["b2"], 0.0)
    ref = jax.nn.sigmoid(h2 @ params["w3"] + params["b3"])
    assert jnp.allclose(out["noise_level"], ref[:, 0], atol=1e-5)
    assert jnp.allclose(out["mix_ratio"], ref[:, 1], atol=1e-5)
    assert jnp.allclose(out["gen_factor"], ref[:, 2] * 5.0 + 1.0, atol=1e-5)

    print("KERNEL_OK")
</pallas_src>

<mosaic_0001>
module attributes {stable_mosaic.version = 11 : i64} {
  func.func @_controller_kernel(%arg0: i32, %arg1: memref<8x4xf32, #tpu.memory_space<vmem>>, %arg2: memref<8x4xf32, #tpu.memory_space<vmem>>, %arg3: memref<88x128xf32, #tpu.memory_space<vmem>>, %arg4: memref<8x128xf32, #tpu.memory_space<vmem>>) attributes {dimension_semantics = [#tpu.dimension_semantics<parallel>], iteration_bounds = array<i64: 1>, scalar_prefetch = 0 : i64, scratch_operands = 0 : i64, tpu.core_type = #tpu.core_type<tc>, window_params = [{transform_indices = @transform_0, window_bounds = array<i64: 8, 4>}, {transform_indices = @transform_1, window_bounds = array<i64: 8, 4>}, {pipeline_mode = #tpu.pipeline_mode<synchronous>, transform_indices = @transform_2, window_bounds = array<i64: 88, 128>}, {transform_indices = @transform_3, window_bounds = array<i64: 8, 128>}]} {
    %c0 = arith.constant 0 : index
    %c0_0 = arith.constant 0 : index
    %0 = vector.load %arg3[%c0, %c0_0] : memref<88x128xf32, #tpu.memory_space<vmem>>, vector<88x128xf32>
    %c0_1 = arith.constant 0 : index
    %c0_2 = arith.constant 0 : index
    %1 = vector.load %arg1[%c0_1, %c0_2] : memref<8x4xf32, #tpu.memory_space<vmem>>, vector<8x4xf32>
    %c0_3 = arith.constant 0 : index
    %c0_4 = arith.constant 0 : index
    %2 = vector.load %arg2[%c0_3, %c0_4] : memref<8x4xf32, #tpu.memory_space<vmem>>, vector<8x4xf32>
    %3 = vector.extract_strided_slice %0 {offsets = [0, 0], sizes = [4, 32], strides = [1, 1]} : vector<88x128xf32> to vector<4x32xf32>
    %4 = vector.extract_strided_slice %0 {offsets = [8, 0], sizes = [4, 32], strides = [1, 1]} : vector<88x128xf32> to vector<4x32xf32>
    %5 = vector.extract_strided_slice %0 {offsets = [16, 0], sizes = [1, 32], strides = [1, 1]} : vector<88x128xf32> to vector<1x32xf32>
    %6 = vector.extract_strided_slice %0 {offsets = [24, 0], sizes = [32, 16], strides = [1, 1]} : vector<88x128xf32> to vector<32x16xf32>
    %7 = vector.extract_strided_slice %0 {offsets = [56, 0], sizes = [1, 16], strides = [1, 1]} : vector<88x128xf32> to vector<1x16xf32>
    %8 = vector.extract_strided_slice %0 {offsets = [64, 0], sizes = [16, 128], strides = [1, 1]} : vector<88x128xf32> to vector<16x128xf32>
    %9 = vector.extract_strided_slice %0 {offsets = [80, 0], sizes = [1, 128], strides = [1, 1]} : vector<88x128xf32> to vector<1x128xf32>
    %cst = arith.constant dense<0.000000e+00> : vector<8x32xf32>
    %10 = tpu.matmul %1, %3, %cst {dimension_numbers = #tpu.dot_dimension_numbers<[1], [0], [0], [1], [0, 0, 1, 1], [], []>} : vector<8x4xf32>, vector<4x32xf32>, vector<8x32xf32> -> vector<8x32xf32>
    %cst_5 = arith.constant dense<0.000000e+00> : vector<8x32xf32>
    %11 = tpu.matmul %2, %4, %cst_5 {dimension_numbers = #tpu.dot_dimension_numbers<[1], [0], [0], [1], [0, 0, 1, 1], [], []>} : vector<8x4xf32>, vector<4x32xf32>, vector<8x32xf32> -> vector<8x32xf32>
    %12 = arith.addf %10, %11 : vector<8x32xf32>
    %13 = vector.broadcast %5 : vector<1x32xf32> to vector<8x32xf32>
    %14 = arith.addf %12, %13 : vector<8x32xf32>
    %cst_6 = arith.constant 0.000000e+00 : f32
    %15 = vector.broadcast %cst_6 : f32 to vector<8x32xf32>
    %16 = arith.maximumf %14, %15 : vector<8x32xf32>
    %cst_7 = arith.constant dense<0.000000e+00> : vector<8x16xf32>
    %17 = tpu.matmul %16, %6, %cst_7 {dimension_numbers = #tpu.dot_dimension_numbers<[1], [0], [0], [1], [0, 0, 1, 1], [], []>} : vector<8x32xf32>, vector<32x16xf32>, vector<8x16xf32> -> vector<8x16xf32>
    %18 = vector.broadcast %7 : vector<1x16xf32> to vector<8x16xf32>
    %19 = arith.addf %17, %18 : vector<8x16xf32>
    %cst_8 = arith.constant 0.000000e+00 : f32
    %20 = vector.broadcast %cst_8 : f32 to vector<8x16xf32>
    %21 = arith.maximumf %19, %20 : vector<8x16xf32>
    %cst_9 = arith.constant dense<0.000000e+00> : vector<8x128xf32>
    %22 = tpu.matmul %21, %8, %cst_9 {dimension_numbers = #tpu.dot_dimension_numbers<[1], [0], [0], [1], [0, 0, 1, 1], [], []>} : vector<8x16xf32>, vector<16x128xf32>, vector<8x128xf32> -> vector<8x128xf32>
    %23 = vector.broadcast %9 : vector<1x128xf32> to vector<8x128xf32>
    %24 = arith.addf %22, %23 : vector<8x128xf32>
    %25 = arith.negf %24 : vector<8x128xf32>
    %26 = math.exp %25 : vector<8x128xf32>
    %cst_10 = arith.constant 1.000000e+00 : f32
    %27 = vector.broadcast %cst_10 : f32 to vector<8x128xf32>
    %28 = arith.addf %27, %26 : vector<8x128xf32>
    %29 = arith.divf %27, %28 : vector<8x128xf32>
    %30 = tpu.iota {dimensions = array<i32: 1>} : vector<8x128xi32>
    %c2_i32 = arith.constant 2 : i32
    %31 = vector.broadcast %c2_i32 : i32 to vector<8x128xi32>
    %32 = arith.cmpi eq, %30, %31 : vector<8x128xi32>
    %cst_11 = arith.constant 5.000000e+00 : f32
    %cst_12 = arith.constant 1.000000e+00 : f32
    %33 = vector.broadcast %cst_11 : f32 to vector<8x128xf32>
    %34 = vector.broadcast %cst_12 : f32 to vector<8x128xf32>
    %35 = arith.select %32, %33, %34 : vector<8x128xi1>, vector<8x128xf32>
    %c2_i32_13 = arith.constant 2 : i32
    %36 = vector.broadcast %c2_i32_13 : i32 to vector<8x128xi32>
    %37 = arith.cmpi eq, %30, %36 : vector<8x128xi32>
    %cst_14 = arith.constant 1.000000e+00 : f32
    %cst_15 = arith.constant 0.000000e+00 : f32
    %38 = vector.broadcast %cst_14 : f32 to vector<8x128xf32>
    %39 = vector.broadcast %cst_15 : f32 to vector<8x128xf32>
    %40 = arith.select %37, %38, %39 : vector<8x128xi1>, vector<8x128xf32>
    %41 = arith.mulf %29, %35 : vector<8x128xf32>
    %42 = arith.addf %41, %40 : vector<8x128xf32>
    %c0_16 = arith.constant 0 : index
    %c0_17 = arith.constant 0 : index
    %43 = vector.load %arg4[%c0_16, %c0_17] : memref<8x128xf32, #tpu.memory_space<vmem>>, vector<8x128xf32>
    tpu.vector_store %arg4[%c0_16, %c0_17], %42 {strides = array<i32>} : memref<8x128xf32, #tpu.memory_space<vmem>>, vector<8x128xf32>,
    return
  }
  func.func @transform_0(%arg0: i32) -> (i32, i32) {
    %c0_i32 = arith.constant 0 : i32
    %c0_i32_0 = arith.constant 0 : i32
    return %arg0, %c0_i32 : i32, i32
  }
  func.func @transform_1(%arg0: i32) -> (i32, i32) {
    %c0_i32 = arith.constant 0 : i32
    %c0_i32_0 = arith.constant 0 : i32
    return %arg0, %c0_i32 : i32, i32
  }
  func.func @transform_2(%arg0: i32) -> (i32, i32) {
    %c0_i32 = arith.constant 0 : i32
    %c0_i32_0 = arith.constant 0 : i32
    %c0_i32_1 = arith.constant 0 : i32
    return %c0_i32, %c0_i32_0 : i32, i32
  }
  func.func @transform_3(%arg0: i32) -> (i32, i32) {
    %c0_i32 = arith.constant 0 : i32
    %c0_i32_0 = arith.constant 0 : i32
    return %arg0, %c0_i32 : i32, i32
  }
}

</mosaic_0001>

<bundles_post_ra>
// kernel: tpu_custom_call.1
= control target key start
LH: loop header
LB: loop body
LE: loop exit
PB: predicated region body
PF: predicated region fallthrough
CT: control target
= control target key end

     0   :  { %8 = vsyncpa [#allocation3], 0  ;;  %s546_s0 = inlined_call_operand.vmem [shape: f32[8,4], index: 0, kind: input, shape index: {}]   ;;  %s547_s1 = inlined_call_operand.vmem [shape: f32[8,4], index: 1, kind: input, shape index: {}]   ;;  %s548_s2 = inlined_call_operand.hbm [shape: f32[88,128], index: 2, kind: input, shape index: {}]   ;;  %s549_s3 = inlined_call_operand.hbm [shape: f32[8,128], index: 3, kind: output, shape index: {}]  }
   0x1   :  { %9 = vsyncpa [#allocation4], 0  ;;  %s490_s12 = smov [#allocation2]  }
   0x2   :  { %s19_s13 = sshll.u32 %s490_s12, 4  ;;  %s20_s13 = int_to_ptr.vmem [resolvable:$true] %s19_s13 }
   0x3   :  { %s454_s14 = scalar_lea.vmem %s20_s13, 1408  ;;  %p459_p1 = scmp.lt.s32.totalorder %s20_s13, %s20_s13 }
   0x4   :  { %p455_p0 = scmp.ne.s32.totalorder %s20_s13, %s454_s14  ;;  %p460_p2 = scmp.lt.s32.totalorder %s454_s14, %s454_s14 }
   0x6   :  { %p461_p3 = por %p460_p2, %p459_p1 }
   0x8   :  { %p462_p4 = pnand %p461_p3, %p455_p0 }
   0xa   :  { %465 = shalt.err (!%p462_p4)
}
   0xb   :  { %s491_s15 = smov 128   ;;  %s492_s16 = smov 8  }
   0xc   :  { %25 = dma.hbm_to_vmem [thread:$0]  %s548_s2, 1408, %s20_s13, [#allocation3], %s491_s15, %s491_s15, %s492_s16  }
   0xd   :  { %486 = dma.done.wait [#allocation3], 1408  }
   0xe   :  { %487 = vsyncadd [#allocation3], 4294965888  ;;  %v493_v0 = vmov 0.0   ;;  %vm494_vm0 = vmmov 0   ;;  %vm46_vm1 = vcmask 1043456   ;;  %vm42_vm2 = vcmask 31744  }
   0xf   :  { %407 = vmatprep.subr.mxu0 %v493_v0  ;;  %412 = vmatprep.subr.mxu1 %v493_v0  ;;  %v30_v1 = vld [vmem:[#allocation2 + $0x8] sm:$0xff]  ;;  %v29_v2 = vld [vmem:[#allocation2] sm:$0xff]  ;;  %v35_v5 = vld [vmem:[#allocation2 + $0x30] sm:$0xff]  ;;  %v196_v9 = vlaneseq  ;;  %vm206_vm3 = vcmask 261120   ;;  %vm285_vm4 = vcmask 130048   ;;  %v495_v38 = vmov 1.0  }
  0x10   :  { %409 = vmatprep.mubr.msk.f32.mxu0 %vm494_vm0, %v493_v0  ;;  %414 = vmatprep.mubr.msk.f32.mxu1 %vm494_vm0, %v493_v0  ;;  %v41_v3 = vld [vmem:[%s547_s1] sm:$0xff]  ;;  %v34_v6 = vld [vmem:[#allocation2 + $0x28] sm:$0xff]  ;;  %v32_v8 = vld [vmem:[#allocation2 + $0x18] sm:$0xff] }
  0x11   :  { %408 = vmatpush3.msk.msra.mxu0 %vm46_vm1, %v30_v1  ;;  %413 = vmatpush3.msk.msra.mxu1 %vm46_vm1, %v29_v2  ;;  %v40_v4 = vld [vmem:[%s546_s0] sm:$0xff]  ;;  %v197_v10 = vshrl.u32 %v196_v9, 7  ;;  %v31_v12 = vld [vmem:[#allocation2 + $0x10] sm:$0xff]  ;;  %v38_v21 = vld [vmem:[#allocation2 + $0x48] sm:$0xff]  ;;  %v366_v37 = vand.u32 127, %v196_v9  ;;  %s496_s0 = smov [#allocation5]  }
  0x12   :  { %410 = vmatmul.mubr.msk.f32.vlgmr.msra.gmra.mxu0 %vm42_vm2, %v41_v3  ;;  %415 = vmatmul.mubr.msk.f32.vlgmr.msra.gmra.mxu1 %vm42_vm2, %v40_v4  ;;  %v33_v7 = vld [vmem:[#allocation2 + $0x20] sm:$0xff]  ;;  %v36_v23 = vld [vmem:[#allocation2 + $0x38] sm:$0xff]  ;;  %v39_v29 = vld [vmem:[#allocation2 + $0x50] sm:$0xff]  ;;  %s379_s1 = sshll.u32 %s496_s0, 4  ;;  %s380_s1 = int_to_ptr.vmem [resolvable:$true] %s379_s1 }
  0x13   :  { %417 = vmatprep.subr.mxu0 %v493_v0  ;;  %425 = vmatprep.mubr.msk.f32.mxu0 %vm494_vm0, %v493_v0  ;;  %v198_v11 = vsub.s32 0, %v197_v10  ;;  %v37_v22 = vld [vmem:[#allocation2 + $0x40] sm:$0xff]  ;;  %vm367_vm5 = vcmp.eq.s32.totalorder %v366_v37, 2  ;;  %s466_s22 = scalar_lea.vmem %s380_s1, 128  ;;  %p471_p6 = scmp.lt.s32.totalorder %s380_s1, %s380_s1 }
  0x14   :  { %428 = vmatprep.subr.mxu1 %v493_v0  ;;  %432 = vmatprep.mubr.msk.f32.mxu1 %vm494_vm0, %v493_v0  ;;  %v368_v39 = vsel %vm367_vm5, 5.0, %v495_v38  ;;  %v369_v41 = vsel %vm367_vm5, 1.0, %v493_v0  ;;  %p467_p5 = scmp.ne.s32.totalorder %s380_s1, %s466_s22  ;;  %p472_p7 = scmp.lt.s32.totalorder %s466_s22, %s466_s22 }
  0x15   :  { %418 = vmatpush3.msra.mxu0 %v35_v5  ;;  %v199_v13 = vrot.slane %v31_v12, %v198_v11  ;;  %429 = vmatpush3.msra.mxu1 %v38_v21  ;;  %v205_v24 = vrot.slane %v36_v23, %v198_v11  ;;  %v284_v30 = vrot.slane %v39_v29, %v198_v11 }
  0x16   :  { %419 = vmatprep.subr.mxu0 %v493_v0  ;;  %430 = vmatprep.subr.mxu1 %v493_v0  ;;  %p473_p8 = por %p472_p7, %p471_p6 }
  0x17   :  { %420 = vmatpush3.msra.mxu0 %v34_v6  ;;  %431 = vmatpush3.msra.mxu1 %v37_v22 }
  0x18   :  { %421 = vmatprep.subr.mxu0 %v493_v0  ;;  %p474_p9 = pnand %p473_p8, %p467_p5 }
  0x19   :  { %422 = vmatpush3.msra.mxu0 %v33_v7 }
  0x1a   :  { %423 = vmatprep.subr.mxu0 %v493_v0 }
  0x1b   :  { %424 = vmatpush3.msra.mxu0 %v32_v8 }
  0xd2   :  { %v116_v14 = vpop.f32.mrf.mxu0  ;;  %v192_v15 = vpop.f32.mrf.mxu1 }
  0xd3   :  { %v193_v16 = vadd.f32 %v192_v15, %v116_v14 }
  0xd4   :  { %v411_v17 = vpop.f32.mrf.mxu0  ;;  %v416_v18 = vpop.f32.mrf.mxu1 }
  0xd5   :  { %v200_v19 = vadd.f32 %v199_v13, %v193_v16 }
  0xd7   :  { %v201_v20 = vmax.f32 %v200_v19, 0.0 }
  0xd9   :  { %426 = vmatmul.mubr.msk.f32.vlgmr.msra.gmra.mxu0 %vm206_vm3, %v201_v20 }
 0x199   :  { %v276_v25 = vpop.f32.mrf.mxu0 }
 0x19a   :  { %v277_v26 = vadd.f32 %v276_v25, %v205_v24 }
 0x19b   :  { %v427_v27 = vpop.f32.mrf.mxu0 }
 0x19c   :  { %v280_v28 = vmax.f32 %v277_v26, 0.0 }
 0x19e   :  { %433 = vmatmul.mubr.msk.f32.vlgmr.msra.gmra.mxu1 %vm285_vm4, %v280_v28 }
 0x25e   :  { %v355_v31 = vpop.f32.mrf.mxu1 }
 0x25f   :  { %v356_v32 = vadd.f32 %v355_v31, %v284_v30 }
 0x260   :  { %v434_v33 = vpop.f32.mrf.mxu1 }
 0x261   :  { %v394_v34 = vmul.f32 -1.442695, %v356_v32 }
 0x263   :  { %442 = vpow2.f32 %v394_v34 }
 0x270   :  { %v443_v35 = vpop.eup %442 }
 0x271   :  { %v362_v36 = vadd.f32 1.0, %v443_v35 }
 0x273   :  { %444 = vrcp.f32 %v362_v36 }
 0x280   :  { %v445_v40 = vpop.eup %444 }
 0x281   :  { %v370_v42 = vmul.f32 %v445_v40, %v368_v39 }
 0x283   :  { %v371_v43 = vadd.f32 %v370_v42, %v369_v41 }
 0x285   :  { %372 = vst [vmem:[#allocation5] sm:$0xff] %v371_v43 }
 0x286   :  { %477 = shalt.err (!%p474_p9)
}
 0x287   :  { %382 = dma.vmem_to_hbm [thread:$0]  %s380_s1, 128, %s549_s3, [#allocation4]  }
 0x288   :  { %488 = dma.done.wait [#allocation4], 128  }
 0x289   :  { %489 = vsyncadd [#allocation4], 4294967168 }
 0x28a   :  { %386 = vsyncpa [#allocation3], 1 }
 0x28b   :  { %387 = vsyncpa [#allocation4], 1 }

</bundles_post_ra>
